<compile_context>
chip_gen: v7x
topology: tpu7x:2x2x1
jax: 0.10.0
libtpu: 0.0.40
codegen_flags: <defaults>
</compile_context>

<pallas_src>
import jax
import jax.numpy as jnp
import numpy as np
from jax.experimental import pallas as pl
from jax.experimental.pallas import tpu as pltpu


def _cdiv(a, b):
    return (a + b - 1) // b


def _round_up(x, m):
    return _cdiv(x, m) * m


def _choose_batch_tile(B, block_batch):
    """Rows per grid step.

    * B <= 128: a single step covering the (sublane-rounded) batch.
    * B  > 128: at least two steps (so the "parallel" batch axis can use both
      v7x TensorCores), a multiple of 128 rows per step (MXU granularity and
      lane-dense row DMAs), capped at `block_batch`.
    """
    if B <= 128:
        return _round_up(B, 8)
    n_steps = max(2, _cdiv(B, block_batch))
    return min(block_batch, _round_up(_cdiv(B, n_steps), 128))


def critic_kernel(s_ref, a_ref, w1s_ref, w1a_ref, b1_ref,
                  w2_ref, b2_ref, w3t_ref, b3_ref, o_ref):
    cdt = w1s_ref.dtype  # MXU operand dtype (f32 or bf16); accumulation is f32.

    # Layer 1: state @ w1_s + action @ w1_a + b1, ReLU.  torch.cat([s, a], 1)
    # is folded into the split weight; both partial products share one f32
    # accumulator.  (Folding the two dots into a single K=32 dot via a small
    # VMEM concat was considered; it is <8% of FLOPs, so it was skipped.)
    h = jnp.dot(s_ref[...].astype(cdt), w1s_ref[...],
                preferred_element_type=jnp.float32)
    h = h + jnp.dot(a_ref[...].astype(cdt), w1a_ref[...],
                    preferred_element_type=jnp.float32)
    h = jnp.maximum(h + b1_ref[...], 0.0)

    # Layer 2 + ReLU (bias add / ReLU stay f32 on the VPU).
    h = jnp.dot(h.astype(cdt), w2_ref[...], preferred_element_type=jnp.float32)
    h = jnp.maximum(h + b2_ref[...], 0.0)

    # Layer 3 as an NT dot: contract the hidden dim of both operands so the
    # MXU emits q already "transposed" (batch on the lane axis).  Row 0 of
    # w3t holds the real layer-3 weight; rows 1..7 are zero padding.  The HBM
    # store is a lane-dense (1, tB) row: 4 B per batch row.
    qT = jax.lax.dot_general(
        w3t_ref[...], h.astype(cdt),
        dimension_numbers=(((1,), (1,)), ((), ())),
        preferred_element_type=jnp.float32)           # (8, tB); row 0 is real
    q_row = qT[:1, :] + b3_ref[...]                   # (1, tB)
    o_ref[...] = q_row.reshape(o_ref.shape).astype(o_ref.dtype)


def critic_forward(state, action, params, *, block_batch=512,
                   compute_dtype=jnp.bfloat16):
    """state: (B, n_states) f32, action: (B, n_actions) f32 -> (B, 1) f32.

    compute_dtype sets the MXU operand dtype only (accumulation, biases and
    ReLU stay f32).  bf16 is the deployment default for v5e/v6e/v7x; pass
    jnp.float32 for reference-exact numerics.
    """
    w1s, w1a, b1, w2, b2, w3t, b3 = params
    B, n_s = state.shape
    _, n_a = action.shape
    hidden = w2.shape[0]

    # bf16 operands halve the one-time weight DMA and the resident VMEM
    # footprint; activations are cast inside the kernel.
    w1s, w1a, w2, w3t = (w.astype(compute_dtype) for w in (w1s, w1a, w2, w3t))

    block_batch = _round_up(block_batch, 128)
    tB = _choose_batch_tile(B, block_batch)
    Bp = _round_up(B, tB)
    n_tiles = Bp // tB
    if Bp != B:
        # One cheap XLA pad pass; only fires when B is not a multiple of the
        # batch tile.  Padded rows produce (discarded) bias-only outputs.
        state = jnp.pad(state, ((0, Bp - B), (0, 0)))
        action = jnp.pad(action, ((0, Bp - B), (0, 0)))

    def row_spec(cols):
        return pl.BlockSpec((tB, cols), lambda i: (i, 0))

    def resident(arr):
        # Constant index_map -> the tile is DMA'd once and stays resident in
        # VMEM across the whole batch grid.
        return pl.BlockSpec(arr.shape, lambda i: (0,) * arr.ndim)

    itemsize = jnp.dtype(compute_dtype).itemsize
    flops = 2 * Bp * (hidden * (n_s + n_a) + hidden * hidden + hidden * 8)
    bytes_accessed = int(
        4 * (Bp * (n_s + n_a)              # activations in (f32)
             + Bp                          # lane-packed q out (4 B/row)
             + b1.size + b2.size + b3.size)
        + itemsize * (w1s.size + w1a.size + w2.size + w3t.size))

    out = pl.pallas_call(
        critic_kernel,
        out_shape=jax.ShapeDtypeStruct((n_tiles, 1, tB), jnp.float32),
        grid=(n_tiles,),
        in_specs=[
            row_spec(n_s), row_spec(n_a),
            resident(w1s), resident(w1a), resident(b1),
            resident(w2), resident(b2),
            resident(w3t), resident(b3),
        ],
        out_specs=pl.BlockSpec((1, 1, tB), lambda i: (i, 0, 0)),
        compiler_params=pltpu.CompilerParams(
            dimension_semantics=("parallel",),
            vmem_limit_bytes=32 * 1024 * 1024,
        ),
        cost_estimate=pl.CostEstimate(
            flops=int(flops), transcendentals=0,
            bytes_accessed=bytes_accessed),
    )(state, action, w1s, w1a, b1, w2, b2, w3t, b3)

    # (n_tiles, 1, tB) lane-packed q values -> (B, 1).
    return out.reshape(Bp)[:B].reshape(B, 1)


def init_params(key, n_states, n_actions, hidden_dim=256):
    """PyTorch nn.Linear-style init: U(-1/sqrt(fan_in), 1/sqrt(fan_in)).

    The reference module hard-codes l1's output width to 256, so it is only
    self-consistent for hidden_dim == 256.
    """
    assert hidden_dim == 256, "Reference Critic only consistent for hidden_dim=256"

    def linear(k, fan_in, fan_out):
        kw, kb = jax.random.split(k)
        bound = 1.0 / float(np.sqrt(fan_in))
        w = jax.random.uniform(kw, (fan_in, fan_out), minval=-bound,
                               maxval=bound, dtype=jnp.float32)
        b = jax.random.uniform(kb, (1, fan_out), minval=-bound,
                               maxval=bound, dtype=jnp.float32)
        return w, b

    k1, k2, k3 = jax.random.split(key, 3)
    w1, b1 = linear(k1, n_states + n_actions, 256)
    w2, b2 = linear(k2, hidden_dim, hidden_dim)
    w3, b3 = linear(k3, hidden_dim, 1)

    # Split w1 so the kernel never needs a concatenated [state, action] input.
    w1s, w1a = w1[:n_states], w1[n_states:]
    # Layer-3 weight stored transposed, zero-padded to 8 sublane rows (row 0
    # is real) so the kernel's NT dot emits a lane-dense q row.
    w3t = jnp.zeros((8, hidden_dim), jnp.float32).at[0, :].set(w3[:, 0])
    b3s = b3.reshape(1, 1)
    return (w1s, w1a, b1, w2, b2, w3t, b3s)


def _int_params(key, n_states, n_actions, hidden_dim=256):
    """Small-integer parameters: every intermediate value is exactly
    representable in bf16 and f32, so the kernel must match the reference
    exactly regardless of MXU precision mode.  Used as a structural
    (tiling / packing / padding) check."""
    ks = jax.random.split(key, 4)
    ri = lambda k, shape: jax.random.randint(k, shape, -2, 3).astype(jnp.float32)
    w1s = ri(ks[0], (n_states, 256))
    w1a = ri(ks[1], (n_actions, 256))
    b1 = ri(ks[2], (1, 256))
    w2 = jnp.eye(hidden_dim, dtype=jnp.float32)   # keeps h2 small and integer
    b2 = jnp.zeros((1, hidden_dim), jnp.float32)
    w3t = jnp.zeros((8, hidden_dim), jnp.float32).at[0, :].set(
        ri(ks[3], (hidden_dim,)))
    b3 = jnp.ones((1, 1), jnp.float32)
    return (w1s, w1a, b1, w2, b2, w3t, b3)


def _reference(state, action, params):
    """Float64 numpy reference of the PyTorch forward pass (exact math)."""
    w1s, w1a, b1, w2, b2, w3t, b3 = (np.asarray(p, np.float64) for p in params)
    sa = np.concatenate([np.asarray(state, np.float64),
                         np.asarray(action, np.float64)], axis=1)
    h = np.maximum(sa @ np.concatenate([w1s, w1a], axis=0) + b1, 0.0)
    h = np.maximum(h @ w2 + b2, 0.0)
    return h @ w3t[:1, :].T + b3


if __name__ == "__main__":
    key = jax.random.PRNGKey(0)
    (k_params, k_ints, k_s1, k_a1, k_s2, k_a2,
     k_s3, k_a3) = jax.random.split(key, 8)

    n_states, n_actions, hidden_dim = 24, 8, 256
    ri = lambda k, shape: jax.random.randint(k, shape, -2, 3).astype(jnp.float32)

    # --- structural checks with small-integer params (exact in bf16 & f32) ---
    iparams = _int_params(k_ints, n_states, n_actions, hidden_dim)

    # Small batch: single grid step, f32 MXU operands.
    s1 = ri(k_s1, (8, n_states))
    a1 = ri(k_a1, (8, n_actions))
    q1 = jax.block_until_ready(
        critic_forward(s1, a1, iparams, compute_dtype=jnp.float32))
    assert q1.shape == (8, 1)
    np.testing.assert_allclose(np.asarray(q1), _reference(s1, a1, iparams),
                               atol=1e-5, rtol=0)

    # Non-tile-aligned batch: 2-step "parallel" grid + row padding + the
    # lane-packed output, on the deployment bf16 path.
    s2 = ri(k_s2, (300, n_states))
    a2 = ri(k_a2, (300, n_actions))
    q2 = jax.block_until_ready(critic_forward(s2, a2, iparams))
    assert q2.shape == (300, 1)
    np.testing.assert_allclose(np.asarray(q2), _reference(s2, a2, iparams),
                               atol=1e-5, rtol=0)

    # --- realistic params (PyTorch-style init), deployment bf16 path ---------
    params = init_params(k_params, n_states, n_actions, hidden_dim)
    s3 = jax.random.normal(k_s3, (300, n_states), dtype=jnp.float32)
    a3 = jax.random.normal(k_a3, (300, n_actions), dtype=jnp.float32)
    q3 = jax.block_until_ready(critic_forward(s3, a3, params))
    assert q3.shape == (300, 1)
    # Loose tolerance: bf16 MXU operands (f32 accumulation) vs float64 ref.
    np.testing.assert_allclose(np.asarray(q3), _reference(s3, a3, params),
                               atol=1.5e-1, rtol=5e-2)

    print("KERNEL_OK")
</pallas_src>

<mosaic_0001>
module attributes {stable_mosaic.version = 11 : i64} {
  func.func @critic_kernel(%arg0: i32, %arg1: memref<8x24xf32, #tpu.memory_space<vmem>>, %arg2: memref<8x8xf32, #tpu.memory_space<vmem>>, %arg3: memref<24x256xf32, #tpu.memory_space<vmem>>, %arg4: memref<8x256xf32, #tpu.memory_space<vmem>>, %arg5: memref<1x256xf32, #tpu.memory_space<vmem>>, %arg6: memref<256x256xf32, #tpu.memory_space<vmem>>, %arg7: memref<1x256xf32, #tpu.memory_space<vmem>>, %arg8: memref<8x256xf32, #tpu.memory_space<vmem>>, %arg9: memref<1x1xf32, #tpu.memory_space<vmem>>, %arg10: memref<1x1x8xf32, #tpu.memory_space<vmem>>) attributes {dimension_semantics = [#tpu.dimension_semantics<parallel>], iteration_bounds = array<i64: 1>, scalar_prefetch = 0 : i64, scratch_operands = 0 : i64, tpu.core_type = #tpu.core_type<tc>, window_params = [{transform_indices = @transform_0, window_bounds = array<i64: 8, 24>}, {transform_indices = @transform_1, window_bounds = array<i64: 8, 8>}, {pipeline_mode = #tpu.pipeline_mode<synchronous>, transform_indices = @transform_2, window_bounds = array<i64: 24, 256>}, {pipeline_mode = #tpu.pipeline_mode<synchronous>, transform_indices = @transform_3, window_bounds = array<i64: 8, 256>}, {pipeline_mode = #tpu.pipeline_mode<synchronous>, transform_indices = @transform_4, window_bounds = array<i64: 1, 256>}, {pipeline_mode = #tpu.pipeline_mode<synchronous>, transform_indices = @transform_5, window_bounds = array<i64: 256, 256>}, {pipeline_mode = #tpu.pipeline_mode<synchronous>, transform_indices = @transform_6, window_bounds = array<i64: 1, 256>}, {pipeline_mode = #tpu.pipeline_mode<synchronous>, transform_indices = @transform_7, window_bounds = array<i64: 8, 256>}, {pipeline_mode = #tpu.pipeline_mode<synchronous>, transform_indices = @transform_8, window_bounds = array<i64: 1, 1>}, {transform_indices = @transform_9, window_bounds = array<i64: 1, 1, 8>}]} {
    %c0 = arith.constant 0 : index
    %c0_0 = arith.constant 0 : index
    %0 = vector.load %arg1[%c0, %c0_0] : memref<8x24xf32, #tpu.memory_space<vmem>>, vector<8x24xf32>
    %c0_1 = arith.constant 0 : index
    %c0_2 = arith.constant 0 : index
    %1 = vector.load %arg3[%c0_1, %c0_2] : memref<24x256xf32, #tpu.memory_space<vmem>>, vector<24x256xf32>
    %cst = arith.constant dense<0.000000e+00> : vector<8x256xf32>
    %2 = tpu.matmul %0, %1, %cst {dimension_numbers = #tpu.dot_dimension_numbers<[1], [0], [0], [1], [0, 0, 1, 1], [], []>} : vector<8x24xf32>, vector<24x256xf32>, vector<8x256xf32> -> vector<8x256xf32>
    %c0_3 = arith.constant 0 : index
    %c0_4 = arith.constant 0 : index
    %3 = vector.load %arg2[%c0_3, %c0_4] : memref<8x8xf32, #tpu.memory_space<vmem>>, vector<8x8xf32>
    %c0_5 = arith.constant 0 : index
    %c0_6 = arith.constant 0 : index
    %4 = vector.load %arg4[%c0_5, %c0_6] : memref<8x256xf32, #tpu.memory_space<vmem>>, vector<8x256xf32>
    %cst_7 = arith.constant dense<0.000000e+00> : vector<8x256xf32>
    %5 = tpu.matmul %3, %4, %cst_7 {dimension_numbers = #tpu.dot_dimension_numbers<[1], [0], [0], [1], [0, 0, 1, 1], [], []>} : vector<8x8xf32>, vector<8x256xf32>, vector<8x256xf32> -> vector<8x256xf32>
    %6 = arith.addf %2, %5 : vector<8x256xf32>
    %c0_8 = arith.constant 0 : index
    %c0_9 = arith.constant 0 : index
    %7 = vector.load %arg5[%c0_8, %c0_9] : memref<1x256xf32, #tpu.memory_space<vmem>>, vector<1x256xf32>
    %8 = vector.broadcast %7 : vector<1x256xf32> to vector<8x256xf32>
    %9 = arith.addf %6, %8 : vector<8x256xf32>
    %cst_10 = arith.constant 0.000000e+00 : f32
    %10 = vector.broadcast %cst_10 : f32 to vector<8x256xf32>
    %11 = arith.maximumf %9, %10 : vector<8x256xf32>
    %c0_11 = arith.constant 0 : index
    %c0_12 = arith.constant 0 : index
    %12 = vector.load %arg6[%c0_11, %c0_12] : memref<256x256xf32, #tpu.memory_space<vmem>>, vector<256x256xf32>
    %cst_13 = arith.constant dense<0.000000e+00> : vector<8x256xf32>
    %13 = tpu.matmul %11, %12, %cst_13 {dimension_numbers = #tpu.dot_dimension_numbers<[1], [0], [0], [1], [0, 0, 1, 1], [], []>} : vector<8x256xf32>, vector<256x256xf32>, vector<8x256xf32> -> vector<8x256xf32>
    %c0_14 = arith.constant 0 : index
    %c0_15 = arith.constant 0 : index
    %14 = vector.load %arg7[%c0_14, %c0_15] : memref<1x256xf32, #tpu.memory_space<vmem>>, vector<1x256xf32>
    %15 = vector.broadcast %14 : vector<1x256xf32> to vector<8x256xf32>
    %16 = arith.addf %13, %15 : vector<8x256xf32>
    %cst_16 = arith.constant 0.000000e+00 : f32
    %17 = vector.broadcast %cst_16 : f32 to vector<8x256xf32>
    %18 = arith.maximumf %16, %17 : vector<8x256xf32>
    %c0_17 = arith.constant 0 : index
    %c0_18 = arith.constant 0 : index
    %19 = vector.load %arg8[%c0_17, %c0_18] : memref<8x256xf32, #tpu.memory_space<vmem>>, vector<8x256xf32>
    %cst_19 = arith.constant dense<0.000000e+00> : vector<8x8xf32>
    %20 = tpu.matmul %19, %18, %cst_19 {dimension_numbers = #tpu.dot_dimension_numbers<[1], [1], [0], [0], [0, 0, 1, 0], [], []>} : vector<8x256xf32>, vector<8x256xf32>, vector<8x8xf32> -> vector<8x8xf32>
    %21 = vector.extract_strided_slice %20 {offsets = [0, 0], sizes = [1, 8], strides = [1, 1]} : vector<8x8xf32> to vector<1x8xf32>
    %c0_20 = arith.constant 0 : index
    %c0_21 = arith.constant 0 : index
    %22 = vector.load %arg9[%c0_20, %c0_21] : memref<1x1xf32, #tpu.memory_space<vmem>>, vector<1x1xf32>
    %23 = vector.broadcast %22 : vector<1x1xf32> to vector<1x8xf32>
    %24 = arith.addf %21, %23 : vector<1x8xf32>
    %25 = vector.shape_cast %24 : vector<1x8xf32> to vector<1x1x8xf32>
    %c0_22 = arith.constant 0 : index
    %c0_23 = arith.constant 0 : index
    %c0_24 = arith.constant 0 : index
    %26 = vector.load %arg10[%c0_22, %c0_23, %c0_24] : memref<1x1x8xf32, #tpu.memory_space<vmem>>, vector<1x1x8xf32>
    tpu.vector_store %arg10[%c0_22, %c0_23, %c0_24], %25 {strides = array<i32>} : memref<1x1x8xf32, #tpu.memory_space<vmem>>, vector<1x1x8xf32>,
    return
  }
  func.func @transform_0(%arg0: i32) -> (i32, i32) {
    %c0_i32 = arith.constant 0 : i32
    %c0_i32_0 = arith.constant 0 : i32
    return %arg0, %c0_i32 : i32, i32
  }
  func.func @transform_1(%arg0: i32) -> (i32, i32) {
    %c0_i32 = arith.constant 0 : i32
    %c0_i32_0 = arith.constant 0 : i32
    return %arg0, %c0_i32 : i32, i32
  }
  func.func @transform_2(%arg0: i32) -> (i32, i32) {
    %c0_i32 = arith.constant 0 : i32
    %c0_i32_0 = arith.constant 0 : i32
    %c0_i32_1 = arith.constant 0 : i32
    return %c0_i32, %c0_i32_0 : i32, i32
  }
  func.func @transform_3(%arg0: i32) -> (i32, i32) {
    %c0_i32 = arith.constant 0 : i32
    %c0_i32_0 = arith.constant 0 : i32
    %c0_i32_1 = arith.constant 0 : i32
    return %c0_i32, %c0_i32_0 : i32, i32
  }
  func.func @transform_4(%arg0: i32) -> (i32, i32) {
    %c0_i32 = arith.constant 0 : i32
    %c0_i32_0 = arith.constant 0 : i32
    %c0_i32_1 = arith.constant 0 : i32
    return %c0_i32, %c0_i32_0 : i32, i32
  }
  func.func @transform_5(%arg0: i32) -> (i32, i32) {
    %c0_i32 = arith.constant 0 : i32
    %c0_i32_0 = arith.constant 0 : i32
    %c0_i32_1 = arith.constant 0 : i32
    return %c0_i32, %c0_i32_0 : i32, i32
  }
  func.func @transform_6(%arg0: i32) -> (i32, i32) {
    %c0_i32 = arith.constant 0 : i32
    %c0_i32_0 = arith.constant 0 : i32
    %c0_i32_1 = arith.constant 0 : i32
    return %c0_i32, %c0_i32_0 : i32, i32
  }
  func.func @transform_7(%arg0: i32) -> (i32, i32) {
    %c0_i32 = arith.constant 0 : i32
    %c0_i32_0 = arith.constant 0 : i32
    %c0_i32_1 = arith.constant 0 : i32
    return %c0_i32, %c0_i32_0 : i32, i32
  }
  func.func @transform_8(%arg0: i32) -> (i32, i32) {
    %c0_i32 = arith.constant 0 : i32
    %c0_i32_0 = arith.constant 0 : i32
    %c0_i32_1 = arith.constant 0 : i32
    return %c0_i32, %c0_i32_0 : i32, i32
  }
  func.func @transform_9(%arg0: i32) -> (i32, i32, i32) {
    %c0_i32 = arith.constant 0 : i32
    %c0_i32_0 = arith.constant 0 : i32
    %c0_i32_1 = arith.constant 0 : i32
    return %arg0, %c0_i32, %c0_i32_0 : i32, i32, i32
  }
}

</mosaic_0001>

<bundles_post_ra>
// kernel: tpu_custom_call.1
= control target key start
LH: loop header
LB: loop body
LE: loop exit
PB: predicated region body
PF: predicated region fallthrough
CT: control target
= control target key end

     0   :  { %s901_s0 = inlined_call_operand.hbm [shape: f32[8,24], index: 0, kind: input, shape index: {}]   ;;  %s902_s1 = inlined_call_operand.hbm [shape: f32[8,8], index: 1, kind: input, shape index: {}]   ;;  %s903_s2 = inlined_call_operand.hbm [shape: f32[24,256], index: 2, kind: input, shape index: {}]   ;;  %s904_s3 = inlined_call_operand.hbm [shape: f32[8,256], index: 3, kind: input, shape index: {}]   ;;  %s905_s4 = inlined_call_operand.vmem [shape: f32[1,256], index: 4, kind: input, shape index: {}]   ;;  %s906_s5 = inlined_call_operand.hbm [shape: f32[256,256], index: 5, kind: input, shape index: {}]   ;;  %s907_s6 = inlined_call_operand.vmem [shape: f32[1,256], index: 6, kind: input, shape index: {}]   ;;  %s908_s7 = inlined_call_operand.vmem [shape: f32[8,256], index: 7, kind: input, shape index: {}]   ;;  %s909_s8 = inlined_call_operand.<no memory space> [shape: f32[1,1], index: 8, kind: input, shape index: {}]   ;;  %s910_s9 = inlined_call_operand.hbm [shape: f32[1,1,8], index: 9, kind: output, shape index: {}]  }
   0x1   :  { %v14_v0 = vstv %s909_s8 }
   0x2   :  { %15 = vst [vmem:[#allocation2] sm:$0x1] %v14_v0 }
   0x3   :  { %16 = vsyncpa [#allocation4], 0 }
   0x4   :  { %17 = vsyncpa [#allocation7], 0 }
   0x5   :  { %18 = vsyncpa [#allocation10], 0 }
   0x6   :  { %19 = vsyncpa [#allocation5], 0  ;;  %s747_s11 = smov [#allocation6]   ;;  %s748_s13 = smov [#allocation9]  }
   0x7   :  { %s36_s12 = sshll.u32 %s747_s11, 4  ;;  %s58_s14 = sshll.u32 %s748_s13, 4  ;;  %s37_s12 = int_to_ptr.vmem [resolvable:$true] %s36_s12  ;;  %s59_s14 = int_to_ptr.vmem [resolvable:$true] %s58_s14 }
   0x8   :  { %s607_s17 = scalar_lea.hbm %s902_s1, 128 }
   0x9   :  { %p608_p0 = scmp.ne.s32.totalorder %s902_s1, %s607_s17  ;;  %p611_p1 = scmp.lt.u32.totalorder %s607_s17, %s902_s1 }
   0xb   :  { %p613_p2 = pnand %p611_p1, %p608_p0 }
   0xd   :  { %616 = shalt.err (!%p613_p2)
}
   0xe   :  { %s617_s21 = scalar_lea.vmem %s37_s12, 128  ;;  %p622_p4 = scmp.lt.s32.totalorder %s37_s12, %s37_s12 }
   0xf   :  { %p618_p3 = scmp.ne.s32.totalorder %s37_s12, %s617_s21  ;;  %p623_p5 = scmp.lt.s32.totalorder %s617_s21, %s617_s21 }
  0x11   :  { %p624_p6 = por %p623_p5, %p622_p4 }
  0x13   :  { %p625_p7 = pnand %p624_p6, %p618_p3 }
  0x15   :  { %628 = shalt.err (!%p625_p7)
}
  0x16   :  { %39 = dma.hbm_to_vmem [thread:$0]  %s902_s1, 128, %s37_s12, [#allocation7]  }
  0x17   :  { %s629_s26 = scalar_lea.hbm %s904_s3, 256 }
  0x18   :  { %p630_p8 = scmp.ne.s32.totalorder %s904_s3, %s629_s26  ;;  %p633_p9 = scmp.lt.u32.totalorder %s629_s26, %s904_s3 }
  0x1a   :  { %p635_p10 = pnand %p633_p9, %p630_p8 }
  0x1c   :  { %638 = shalt.err (!%p635_p10)
}
  0x1d   :  { %s639_s10 = scalar_lea.vmem %s59_s14, 256  ;;  %p644_p12 = scmp.lt.s32.totalorder %s59_s14, %s59_s14 }
  0x1e   :  { %p640_p11 = scmp.ne.s32.totalorder %s59_s14, %s639_s10  ;;  %p645_p13 = scmp.lt.s32.totalorder %s639_s10, %s639_s10 }
  0x20   :  { %p646_p0 = por %p645_p13, %p644_p12 }
  0x22   :  { %p647_p1 = pnand %p646_p0, %p640_p11 }
  0x24   :  { %650 = shalt.err (!%p647_p1)
}
  0x25   :  { %61 = dma.hbm_to_vmem [thread:$0]  %s904_s3, 256, %s59_s14, [#allocation10]  }
  0x26   :  { %s749_s12 = smov [#allocation3]   ;;  %s750_s15 = smov [#allocation8]  }
  0x27   :  { %s26_s13 = sshll.u32 %s749_s12, 4  ;;  %s45_s16 = sshll.u32 %s750_s15, 4  ;;  %s27_s13 = int_to_ptr.vmem [resolvable:$true] %s26_s13  ;;  %s834_s16 = int_to_ptr.vmem [resolvable:$true] %s45_s16 }
  0x28   :  { %s651_s19 = scalar_lea.hbm %s901_s0, 128 }
  0x29   :  { %p652_p2 = scmp.ne.s32.totalorder %s901_s0, %s651_s19  ;;  %p655_p3 = scmp.lt.u32.totalorder %s651_s19, %s901_s0 }
  0x2b   :  { %p657_p4 = pnand %p655_p3, %p652_p2 }
  0x2d   :  { %660 = shalt.err (!%p657_p4)
}
  0x2e   :  { %s661_s3 = scalar_lea.vmem %s27_s13, 128  ;;  %p666_p6 = scmp.lt.s32.totalorder %s27_s13, %s27_s13 }
  0x2f   :  { %p662_p5 = scmp.ne.s32.totalorder %s27_s13, %s661_s3  ;;  %p667_p7 = scmp.lt.s32.totalorder %s661_s3, %s661_s3 }
  0x31   :  { %p668_p8 = por %p667_p7, %p666_p6 }
  0x33   :  { %p669_p9 = pnand %p668_p8, %p662_p5 }
  0x35   :  { %672 = shalt.err (!%p669_p9)
}
  0x36   :  { %29 = dma.hbm_to_vmem [thread:$0]  %s901_s0, 128, %s27_s13, [#allocation4]  }
  0x37   :  { %s673_s26 = scalar_lea.hbm %s903_s2, 768 }
  0x38   :  { %p674_p10 = scmp.ne.s32.totalorder %s903_s2, %s673_s26  ;;  %p677_p11 = scmp.lt.u32.totalorder %s673_s26, %s903_s2 }
  0x3a   :  { %p679_p12 = pnand %p677_p11, %p674_p10 }
  0x3c   :  { %682 = shalt.err (!%p679_p12)
}
  0x3d   :  { %s683_s10 = scalar_lea.vmem %s834_s16, 768  ;;  %p688_p0 = scmp.lt.s32.totalorder %s834_s16, %s834_s16 }
  0x3e   :  { %p684_p13 = scmp.ne.s32.totalorder %s834_s16, %s683_s10  ;;  %p689_p1 = scmp.lt.s32.totalorder %s683_s10, %s683_s10 }
  0x40   :  { %p690_p2 = por %p689_p1, %p688_p0 }
  0x42   :  { %p691_p3 = pnand %p690_p2, %p684_p13 }
  0x44   :  { %694 = shalt.err (!%p691_p3)
}
  0x45   :  { %s751_s0 = smov 256   ;;  %s752_s1 = smov 16  }
  0x46   :  { %51 = dma.hbm_to_vmem [thread:$0]  %s903_s2, 768, %s834_s16, [#allocation7], %s751_s0, %s751_s0, %s752_s1  }
  0x47   :  { %s753_s13 = smov [#allocation11]   ;;  %s695_s19 = scalar_lea.hbm %s906_s5, 8192 }
  0x48   :  { %s69_s15 = sshll.u32 %s753_s13, 4  ;;  %p696_p4 = scmp.ne.s32.totalorder %s906_s5, %s695_s19  ;;  %s70_s15 = int_to_ptr.vmem [resolvable:$true] %s69_s15 }
  0x49   :  { %p699_p5 = scmp.lt.u32.totalorder %s695_s19, %s906_s5 }
  0x4b   :  { %p701_p6 = pnand %p699_p5, %p696_p4 }
  0x4d   :  { %704 = shalt.err (!%p701_p6)
}
  0x4e   :  { %s705_s3 = scalar_lea.vmem %s70_s15, 8192  ;;  %p710_p8 = scmp.lt.s32.totalorder %s70_s15, %s70_s15 }
  0x4f   :  { %p706_p7 = scmp.ne.s32.totalorder %s70_s15, %s705_s3  ;;  %p711_p9 = scmp.lt.s32.totalorder %s705_s3, %s705_s3 }
  0x51   :  { %p712_p10 = por %p711_p9, %p710_p8 }
  0x53   :  { %p713_p11 = pnand %p712_p10, %p706_p7 }
  0x55   :  { %716 = shalt.err (!%p713_p11)
}
  0x56   :  { %75 = dma.hbm_to_vmem [thread:$0]  %s906_s5, 8192, %s70_s15, [#allocation10], %s751_s0, %s751_s0, %s752_s1  }
  0x57   :  { %739 = dma.done.wait [#allocation4], 128  }
  0x58   :  { %740 = vsyncadd [#allocation4], 4294967168 }
  0x59   :  { %741 = dma.done.wait [#allocation7], 896  }
  0x5a   :  { %742 = vsyncadd [#allocation7], 4294966400 }
  0x5b   :  { %743 = dma.done.wait [#allocation10], 8448  }
  0x5c   :  { %744 = vsyncadd [#allocation10], 4294958848  ;;  %v754_v1 = vmov 0.0   ;;  %v106_v2 = vld [vmem:[#allocation9 + $0x8] sm:$0xff]  ;;  %v105_v3 = vld [vmem:[#allocation9] sm:$0xff]  ;;  %vm107_vm0 = vcmask 64512  }
  0x5d   :  { %175 = vmatprep.mubr.f32.mxu0 %v754_v1  ;;  %v104_v4 = vld [vmem:[#allocation6] sm:$0xff]  ;;  %111 = vmatprep.subr.mxu0 %v106_v2  ;;  %v99_v5 = vld [vmem:[#allocation8 + $0x8] sm:$0xff]  ;;  %v98_v7 = vld [vmem:[#allocation8] sm:$0xff]  ;;  %vm182_vm1 = vcmask 195584   ;;  %s756_s28 = smov [#allocation12]   ;;  %vm505_vm2 = vcmask 57344  }
  0x5e   :  { %v101_v6 = vld [vmem:[#allocation8 + $0x18] sm:$0xff]  ;;  %112 = vmatpush1.msra.mxu0 %v105_v3  ;;  %v100_v9 = vld [vmem:[#allocation8 + $0x10] sm:$0xff]  ;;  %v103_v11 = vld [vmem:[#allocation8 + $0x28] sm:$0xff]  ;;  %s513_s29 = sshll.u32 %s756_s28, 4  ;;  %s514_s29 = int_to_ptr.vmem [resolvable:$true] %s513_s29 }
  0x5f   :  { %v526_v8 = vpack.c.bf16 %v101_v6, %v99_v5  ;;  %524 = vmatmul.mubr.msk.f32.vlgmr.msra.gmra.mrb[0].mxu0 %vm107_vm0, %v104_v4  ;;  %v528_v10 = vpack.c.bf16 %v100_v9, %v98_v7  ;;  %v274_v12 = vld [vmem:[#allocation11 + $0x8] sm:$0xff]  ;;  %v276_v13 = vld [vmem:[#allocation11 + $0x18] sm:$0xff]  ;;  %v273_v15 = vld [vmem:[#allocation11] sm:$0xff]  ;;  %s721_s30 = scalar_lea.vmem %s514_s29, 32  ;;  %p722_p13 = scmp.lt.s32.totalorder %s514_s29, %s514_s29 }
  0x60   :  { %250 = vmatprep.mubr.f32.mxu0 %v754_v1  ;;  %v530_v14 = vpack.c.bf16 %v276_v13, %v274_v12  ;;  %v275_v16 = vld [vmem:[#allocation11 + $0x10] sm:$0xff]  ;;  %v278_v17 = vld [vmem:[#allocation11 + $0x28] sm:$0xff]  ;;  %v280_v19 = vld [vmem:[#allocation11 + $0x38] sm:$0xff] }
  0x61   :  { %527 = vmatprep.subr.bf16.mxu0 %v526_v8  ;;  %v532_v18 = vpack.c.bf16 %v275_v16, %v273_v15  ;;  %v277_v20 = vld [vmem:[#allocation11 + $0x20] sm:$0xff]  ;;  %v279_v21 = vld [vmem:[#allocation11 + $0x30] sm:$0xff]  ;;  %v534_v23 = vpack.c.bf16 %v280_v19, %v278_v17  ;;  %v282_v24 = vld [vmem:[#allocation11 + $0x48] sm:$0xff] }
  0x62   :  { %529 = vmatpush1.bf16.msra.mxu0 %v528_v10  ;;  %v102_v22 = vld [vmem:[#allocation8 + $0x20] sm:$0xff]  ;;  %531 = vmatprep.subr.bf16.mxu1 %v530_v14  ;;  %v284_v25 = vld [vmem:[#allocation11 + $0x58] sm:$0xff]  ;;  %v536_v26 = vpack.c.bf16 %v279_v21, %v277_v20  ;;  %v97_v27 = vld [vmem:[#allocation3] sm:$0xff] }
  0x63   :  { %190 = vmatprep.subr.mxu0 %v103_v11  ;;  %533 = vmatpush1.bf16.msra.mxu1 %v532_v18  ;;  %v538_v28 = vpack.c.bf16 %v284_v25, %v282_v24  ;;  %v281_v29 = vld [vmem:[#allocation11 + $0x40] sm:$0xff]  ;;  %v283_v30 = vld [vmem:[#allocation11 + $0x50] sm:$0xff]  ;;  %v286_v31 = vld [vmem:[#allocation11 + $0x68] sm:$0xff] }
  0x64   :  { %535 = vmatprep.subr.bf16.mxu1 %v534_v23  ;;  %v288_v32 = vld [vmem:[#allocation11 + $0x78] sm:$0xff]  ;;  %v540_v33 = vpack.c.bf16 %v283_v30, %v281_v29  ;;  %v285_v35 = vld [vmem:[#allocation11 + $0x60] sm:$0xff]  ;;  %v287_v36 = vld [vmem:[#allocation11 + $0x70] sm:$0xff] }
  0x65   :  { %v542_v34 = vpack.c.bf16 %v288_v32, %v286_v31  ;;  %v290_v37 = vld [vmem:[#allocation11 + $0x88] sm:$0xff]  ;;  %v292_v38 = vld [vmem:[#allocation11 + $0x98] sm:$0xff]  ;;  %v544_v39 = vpack.c.bf16 %v287_v36, %v285_v35  ;;  %v289_v41 = vld [vmem:[#allocation11 + $0x80] sm:$0xff] }
  0x66   :  { %191 = vmatpush1.msra.mxu0 %v102_v22  ;;  %v546_v40 = vpack.c.bf16 %v292_v38, %v290_v37  ;;  %v291_v42 = vld [vmem:[#allocation11 + $0x90] sm:$0xff]  ;;  %v294_v43 = vld [vmem:[#allocation11 + $0xa8] sm:$0xff]  ;;  %v296_v44 = vld [vmem:[#allocation11 + $0xb8] sm:$0xff] }
  0x67   :  { %525 = vmatmul.mubr.msk.f32.vlgmr.msra.gmra.mrb[0].mxu0 %vm182_vm1, %v97_v27  ;;  %537 = vmatpush1.bf16.msra.mxu1 %v536_v26  ;;  %v548_v45 = vpack.c.bf16 %v291_v42, %v289_v41  ;;  %v550_v46 = vpack.c.bf16 %v296_v44, %v294_v43  ;;  %v293_v47 = vld [vmem:[#allocation11 + $0xa0] sm:$0xff]  ;;  %v295_v48 = vld [vmem:[#allocation11 + $0xb0] sm:$0xff]  ;;  %v298_v49 = vld [vmem:[#allocation11 + $0xc8] sm:$0xff] }
  0x68   :  { %539 = vmatprep.subr.bf16.mxu1 %v538_v28  ;;  %v300_v50 = vld [vmem:[#allocation11 + $0xd8] sm:$0xff]  ;;  %v552_v51 = vpack.c.bf16 %v295_v48, %v293_v47  ;;  %v297_v53 = vld [vmem:[#allocation11 + $0xc0] sm:$0xff]  ;;  %v299_v54 = vld [vmem:[#allocation11 + $0xd0] sm:$0xff] }
  0x69   :  { %v554_v52 = vpack.c.bf16 %v300_v50, %v298_v49  ;;  %v302_v55 = vld [vmem:[#allocation11 + $0xe8] sm:$0xff]  ;;  %v304_v56 = vld [vmem:[#allocation11 + $0xf8] sm:$0xff]  ;;  %v556_v57 = vpack.c.bf16 %v299_v54, %v297_v53  ;;  %v301_v59 = vld [vmem:[#allocation11 + $0xe0] sm:$0xff] }
  0x6a   :  { %v558_v58 = vpack.c.bf16 %v304_v56, %v302_v55  ;;  %v303_v60 = vld [vmem:[#allocation11 + $0xf0] sm:$0xff]  ;;  %v306_v61 = vld [vmem:[#allocation11 + $0x108] sm:$0xff]  ;;  %v308_v62 = vld [vmem:[#allocation11 + $0x118] sm:$0xff] }
  0x6b   :  { %541 = vmatpush1.bf16.msra.mxu1 %v540_v33  ;;  %v560_v63 = vpack.c.bf16 %v303_v60, %v301_v59  ;;  %v562_v0 = vpack.c.bf16 %v308_v62, %v306_v61  ;;  %v305_v1 = vld [vmem:[#allocation11 + $0x100] sm:$0xff]  ;;  %v307_v2 = vld [vmem:[#allocation11 + $0x110] sm:$0xff]  ;;  %v310_v3 = vld [vmem:[#allocation11 + $0x128] sm:$0xff]  ;;  %v755_v61 = vmov 0  }
  0x6c   :  { %543 = vmatprep.subr.bf16.mxu1 %v542_v34  ;;  %v312_v4 = vld [vmem:[#allocation11 + $0x138] sm:$0xff]  ;;  %v564_v5 = vpack.c.bf16 %v307_v2, %v305_v1  ;;  %v309_v7 = vld [vmem:[#allocation11 + $0x120] sm:$0xff]  ;;  %v311_v8 = vld [vmem:[#allocation11 + $0x130] sm:$0xff]  ;;  %606 = vset.pattern.permute.xlu0 %v755_v61 }
  0x6d   :  { %v566_v6 = vpack.c.bf16 %v312_v4, %v310_v3  ;;  %v314_v9 = vld [vmem:[#allocation11 + $0x148] sm:$0xff]  ;;  %v316_v10 = vld [vmem:[#allocation11 + $0x158] sm:$0xff]  ;;  %v568_v11 = vpack.c.bf16 %v311_v8, %v309_v7  ;;  %v313_v13 = vld [vmem:[#allocation11 + $0x140] sm:$0xff] }
  0x6e   :  { %v570_v12 = vpack.c.bf16 %v316_v10, %v314_v9  ;;  %v315_v14 = vld [vmem:[#allocation11 + $0x150] sm:$0xff]  ;;  %v318_v15 = vld [vmem:[#allocation11 + $0x168] sm:$0xff]  ;;  %v320_v16 = vld [vmem:[#allocation11 + $0x178] sm:$0xff] }
  0x6f   :  { %545 = vmatpush1.bf16.msra.mxu1 %v544_v39  ;;  %v572_v17 = vpack.c.bf16 %v315_v14, %v313_v13  ;;  %v574_v18 = vpack.c.bf16 %v320_v16, %v318_v15  ;;  %v317_v19 = vld [vmem:[#allocation11 + $0x160] sm:$0xff]  ;;  %v319_v20 = vld [vmem:[#allocation11 + $0x170] sm:$0xff]  ;;  %v322_v21 = vld [vmem:[#allocation11 + $0x188] sm:$0xff] }
  0x70   :  { %547 = vmatprep.subr.bf16.mxu1 %v546_v40  ;;  %v324_v22 = vld [vmem:[#allocation11 + $0x198] sm:$0xff]  ;;  %v576_v23 = vpack.c.bf16 %v319_v20, %v317_v19  ;;  %v321_v25 = vld [vmem:[#allocation11 + $0x180] sm:$0xff]  ;;  %v323_v26 = vld [vmem:[#allocation11 + $0x190] sm:$0xff] }
  0x71   :  { %v578_v24 = vpack.c.bf16 %v324_v22, %v322_v21  ;;  %v326_v27 = vld [vmem:[#allocation11 + $0x1a8] sm:$0xff]  ;;  %v328_v28 = vld [vmem:[#allocation11 + $0x1b8] sm:$0xff]  ;;  %v580_v29 = vpack.c.bf16 %v323_v26, %v321_v25  ;;  %v325_v31 = vld [vmem:[#allocation11 + $0x1a0] sm:$0xff] }
  0x72   :  { %v582_v30 = vpack.c.bf16 %v328_v28, %v326_v27  ;;  %v327_v32 = vld [vmem:[#allocation11 + $0x1b0] sm:$0xff]  ;;  %v330_v33 = vld [vmem:[#allocation11 + $0x1c8] sm:$0xff]  ;;  %v332_v34 = vld [vmem:[#allocation11 + $0x1d8] sm:$0xff] }
  0x73   :  { %549 = vmatpush1.bf16.msra.mxu1 %v548_v45  ;;  %v584_v35 = vpack.c.bf16 %v327_v32, %v325_v31  ;;  %v586_v36 = vpack.c.bf16 %v332_v34, %v330_v33  ;;  %v329_v37 = vld [vmem:[#allocation11 + $0x1c0] sm:$0xff]  ;;  %v331_v38 = vld [vmem:[#allocation11 + $0x1d0] sm:$0xff]  ;;  %v334_v40 = vld [vmem:[#allocation11 + $0x1e8] sm:$0xff] }
  0x74   :  { %551 = vmatprep.subr.bf16.mxu1 %v550_v46  ;;  %v588_v39 = vpack.c.bf16 %v331_v38, %v329_v37  ;;  %v336_v41 = vld [vmem:[#allocation11 + $0x1f8] sm:$0xff]  ;;  %v333_v43 = vld [vmem:[#allocation11 + $0x1e0] sm:$0xff]  ;;  %v335_v44 = vld [vmem:[#allocation11 + $0x1f0] sm:$0xff]  ;;  %v259_v46 = vlaneseq }
  0x75   :  { %v590_v42 = vpack.c.bf16 %v336_v41, %v334_v40  ;;  %v592_v45 = vpack.c.bf16 %v335_v44, %v333_v43  ;;  %v257_v49 = vld [vmem:[%s905_s4] sm:$0x3]  ;;  %v423_v59 = vld [vmem:[%s908_s7 + $0x8] sm:$0xff] }
  0x76   :  { %v260_v47 = vshrl.u32 %v259_v46, 7  ;;  %488 = vmatprep.mubr.f32.mxu0 %v423_v59  ;;  %v494_v60 = vld [vmem:[#allocation2] sm:$0x1] }
  0x77   :  { %553 = vmatpush1.bf16.msra.mxu1 %v552_v51  ;;  %497 = vperm.xlu0 %606, %v494_v60   ;;  %v337_v62 = vld [vmem:[%s907_s6] sm:$0x3]  ;;  %s717_s6 = scalar_lea.vmem %s514_s29, 16 }
  0x78   :  { %555 = vmatprep.subr.bf16.mxu1 %v554_v52  ;;  %v261_v48 = vsub.s32 0, %v260_v47  ;;  %v265_v50 = vsub.s32 1, %v260_v47  ;;  %v422_v7 = vld [vmem:[%s908_s7] sm:$0xff]  ;;  %p718_p12 = scmp.ne.s32.totalorder %s514_s29, %s717_s6  ;;  %p723_p0 = scmp.lt.s32.totalorder %s721_s30, %s717_s6 }
  0x7a   :  { %v262_v51 = vrot.slane %v257_v49, %v261_v48  ;;  %v266_v52 = vrot.slane %v257_v49, %v265_v50  ;;  %p724_p1 = por %p723_p0, %p722_p13 }
  0x7b   :  { %557 = vmatpush1.bf16.msra.mxu1 %v556_v57 }
  0x7c   :  { %559 = vmatprep.subr.bf16.mxu1 %v558_v58  ;;  %p725_p2 = pnand %p724_p1, %p718_p12 }
  0x7f   :  { %561 = vmatpush1.bf16.msra.mxu1 %v560_v63  ;;  %v342_v63 = vrot.slane %v337_v62, %v261_v48 }
  0x80   :  { %563 = vmatprep.subr.bf16.mxu1 %v562_v0  ;;  %v346_v0 = vrot.slane %v337_v62, %v265_v50 }
  0x83   :  { %565 = vmatpush1.bf16.msra.mxu1 %v564_v5 }
  0x84   :  { %567 = vmatprep.subr.bf16.mxu1 %v566_v6 }
  0x87   :  { %569 = vmatpush1.bf16.msra.mxu1 %v568_v11 }
  0x88   :  { %571 = vmatprep.subr.bf16.mxu1 %v570_v12 }
  0x8b   :  { %573 = vmatpush1.bf16.msra.mxu1 %v572_v17 }
  0x8c   :  { %575 = vmatprep.subr.bf16.mxu1 %v574_v18 }
  0x8f   :  { %577 = vmatpush1.bf16.msra.mxu1 %v576_v23 }
  0x90   :  { %579 = vmatprep.subr.bf16.mxu1 %v578_v24 }
  0x93   :  { %581 = vmatpush1.bf16.msra.mxu1 %v580_v29 }
  0x94   :  { %583 = vmatprep.subr.bf16.mxu1 %v582_v30 }
  0x97   :  { %585 = vmatpush1.bf16.msra.mxu1 %v584_v35 }
  0x98   :  { %587 = vmatprep.subr.bf16.mxu1 %v586_v36 }
  0x9b   :  { %589 = vmatpush1.bf16.msra.mxu1 %v588_v39 }
  0x9c   :  { %591 = vmatprep.subr.bf16.mxu1 %v590_v42 }
  0x9f   :  { %593 = vmatpush1.bf16.msra.mxu1 %v592_v45 }
  0xf6   :  { %v498_v8 = vpop.permute.xlu0 %497 }
  0xf7   :  { %v503_v9 = vrot.slane %v498_v8, %v261_v48 }
 0x13a   :  { %v252_v53 = vpop.f32.mrb[0].mxu0 }
 0x13b   :  { %v269_v54 = vadd.f32 %v262_v51, %v252_v53  ;;  %v254_v55 = vpop.f32.mrb[1].mxu0 }
 0x13c   :  { %v270_v56 = vadd.f32 %v266_v52, %v254_v55 }
 0x13d   :  { %v271_v58 = vmax.f32 %v269_v54, 0.0 }
 0x13e   :  { %v272_v57 = vmax.f32 %v270_v56, 0.0 }
 0x140   :  { %413 = vmatprep.mubr.f32.mxu1 %v272_v57 }
 0x141   :  { %414 = vmatmul.mubr.f32.vlgmr.msra.gmra.mrb[0].mxu1 %v271_v58 }
 0x214   :  { %v415_v1 = vpop.f32.mrb[0].mxu1 }
 0x215   :  { %v416_v2 = vadd.f32 %v415_v1, %v342_v63  ;;  %v417_v3 = vpop.f32.mrb[1].mxu1 }
 0x216   :  { %v418_v4 = vadd.f32 %v417_v3, %v346_v0 }
 0x217   :  { %v420_v6 = vmax.f32 %v416_v2, 0.0 }
 0x218   :  { %v421_v5 = vmax.f32 %v418_v4, 0.0 }
 0x21a   :  { %424 = vmatprep.subr.mxu0 %v421_v5 }
 0x21b   :  { %425 = vmatpush1.xpose.msra.mxu0 %v420_v6 }
 0x21e   :  { %489 = vmatmul.mubr.f32.vlgmr.msra.gmra.mrb[2].mxu0 %v422_v7 }
 0x2f1   :  { %v490_v10 = vpop.f32.mrb[2].mxu0 }
 0x2f2   :  { %v504_v11 = vadd.f32 %v503_v9, %v490_v10  ;;  %v492_v12 = vpop.f32.mrb[3].mxu0 }
 0x2f4   :  { %506 = vst.msk [vmem:[#allocation12] sm:$0x1] %vm505_vm2, %v504_v11 }
 0x2f5   :  { %728 = shalt.err (!%p725_p2)
}
 0x2f6   :  { %s729_s0 = scalar_lea.hbm %s910_s9, 16 }
 0x2f7   :  { %p730_p3 = scmp.ne.s32.totalorder %s910_s9, %s729_s0  ;;  %p733_p4 = scmp.lt.u32.totalorder %s729_s0, %s910_s9 }
 0x2f9   :  { %p735_p5 = pnand %p733_p4, %p730_p3 }
 0x2fb   :  { %738 = shalt.err (!%p735_p5)
}
 0x2fc   :  { %516 = dma.vmem_to_hbm [thread:$0]  %s514_s29, 16, %s910_s9, [#allocation5]  }
 0x2fd   :  { %745 = dma.done.wait [#allocation5], 16  }
 0x2fe   :  { %746 = vsyncadd [#allocation5], 4294967280 }
 0x2ff   :  { %520 = vsyncpa [#allocation4], 1 }
 0x300   :  { %521 = vsyncpa [#allocation7], 1 }
 0x301   :  { %522 = vsyncpa [#allocation10], 1 }
 0x302   :  { %523 = vsyncpa [#allocation5], 1 }

</bundles_post_ra>
